<compile_context>
chip_gen: v6e
topology: v6e:2x2x1
jax: 0.10.0
libtpu: 0.0.40
codegen_flags: <defaults>
</compile_context>

<pallas_src>
import functools

import jax
import jax.numpy as jnp
from jax.experimental import pallas as pl
from jax.experimental.pallas import tpu as pltpu


def _round_up(x, m):
    return ((x + m - 1) // m) * m


def _tensorcore_count():
    """Best-effort TensorCore-per-chip count (1 on v5e/v6e, 2 on v7x)."""
    try:
        info = pltpu.get_tpu_info()
        for name in ("num_cores", "core_count", "num_tensorcores",
                     "tensorcore_count", "cores_per_chip", "num_cores_per_chip"):
            v = getattr(info, name, None)
            if isinstance(v, int) and v > 0:
                return v
    except Exception:
        pass
    try:
        kind = jax.devices()[0].device_kind.lower()
        if "v7" in kind:
            return 2
    except Exception:
        pass
    return 1


def _choose_tile(B, batch_tile, n_cores):
    """Batch tile: single big tile on 1-TC chips; balanced minimal-pad split on 2-TC."""
    B8 = _round_up(B, 8)
    if n_cores <= 1 or B <= 8:
        tile = min(_round_up(max(batch_tile, 8), 8), B8)
    else:
        n_steps = n_cores * max(1, -(-B // (n_cores * max(batch_tile, 8))))
        tile = _round_up(-(-B // n_steps), 8)
    tile = max(8, tile)
    n_tiles = -(-B // tile)
    return tile, n_tiles


def _resident_spec(shape):
    """BlockSpec for a grid-constant (weight/bias) operand; single-buffered if supported."""
    index_map = lambda i: (0,) * len(shape)
    try:
        return pl.BlockSpec(shape, index_map, pipeline_mode=pl.Buffered(1))
    except Exception:
        return pl.BlockSpec(shape, index_map)


def actor_kernel(state_ref, w1_ref, b1_ref, w2_ref, b2_ref, w3_ref, b3_ref,
                 out_ref, *, max_action):
    """Whole forward pass on one batch tile (three matmuls + activations).

    MXU inputs are cast to the weight dtype (f32 or bf16); accumulation and the
    elementwise epilogue (bias, ReLU, tanh, scale) stay f32.
    """
    wdt = w1_ref.dtype
    x = state_ref[...].astype(wdt)                                   # [TB, state_dim]

    h1 = jnp.dot(x, w1_ref[...], preferred_element_type=jnp.float32) + b1_ref[...]
    h1 = jnp.maximum(h1, 0.0)                                        # relu (f32)

    h2 = jnp.dot(h1.astype(wdt), w2_ref[...],
                 preferred_element_type=jnp.float32) + b2_ref[...]
    h2 = jnp.maximum(h2, 0.0)                                        # relu (f32)

    a = jnp.dot(h2.astype(wdt), w3_ref[...],
                preferred_element_type=jnp.float32) + b3_ref[...]
    out_ref[...] = (max_action * jnp.tanh(a)).astype(out_ref.dtype)  # EUP tanh


def prepare_actor_params(raw, *, weight_dtype=None):
    """One-time parameter prep (call at init, NOT per forward).

    Pads W3/b3 output lanes to a multiple of 128 (lane-dense stores) and optionally
    casts W1/W2/W3 to `weight_dtype` (e.g. jnp.bfloat16) for MXU throughput on
    v6e/v7x. Note: the bf16 path also casts the state and h1/h2 activations to bf16
    for the matmuls (slightly more precision loss than weight-only quantization).
    """
    w1, b1 = raw["w1"], raw["b1"]
    w2, b2 = raw["w2"], raw["b2"]
    w3, b3 = raw["w3"], raw["b3"]
    action_dim = int(w3.shape[1])
    A_pad = _round_up(action_dim, 128)
    if A_pad != action_dim:
        w3 = jnp.pad(w3, ((0, 0), (0, A_pad - action_dim)))
        b3 = jnp.pad(b3, ((0, 0), (0, A_pad - action_dim)))
    if weight_dtype is not None:
        w1 = w1.astype(weight_dtype)
        w2 = w2.astype(weight_dtype)
        w3 = w3.astype(weight_dtype)
    return {
        "w1": w1, "b1": b1.reshape(1, -1).astype(jnp.float32),
        "w2": w2, "b2": b2.reshape(1, -1).astype(jnp.float32),
        "w3": w3, "b3": b3.reshape(1, -1).astype(jnp.float32),
        "action_dim": action_dim,
    }


def actor_forward(state, params, max_action, *, batch_tile=512, num_cores=None):
    """state: [B, state_dim] float32. params: output of prepare_actor_params.

    Returns a PADDED output of shape (B_pad, A_pad); only [:B, :action_dim] is
    meaningful (caller slices or, better, fuses the slice into its consumer).
    """
    w1, b1 = params["w1"], params["b1"]
    w2, b2 = params["w2"], params["b2"]
    w3, b3 = params["w3"], params["b3"]

    B, state_dim = state.shape
    hidden = w1.shape[1]
    A_pad = w3.shape[1]

    if num_cores is None:
        num_cores = _tensorcore_count()

    # ---- Batch tiling (core-count aware, minimal padding). ----
    tile, n_tiles = _choose_tile(B, batch_tile, num_cores)
    B_pad = tile * n_tiles
    if B_pad != B:
        state = jnp.pad(state, ((0, B_pad - B), (0, 0)))   # rows only; K stays unpadded
    grid = (n_tiles,)

    # Advisory cost estimate so XLA can schedule/overlap this small call.
    itemsize = jnp.dtype(w1.dtype).itemsize
    flops = 2 * B_pad * (state_dim * hidden + hidden * hidden + hidden * A_pad)
    transcendentals = B_pad * A_pad
    bytes_accessed = (
        B_pad * state_dim * 4
        + (w1.size + w2.size + w3.size) * itemsize
        + (b1.size + b2.size + b3.size) * 4
        + B_pad * A_pad * 4
    )
    cost = pl.CostEstimate(flops=int(flops),
                           transcendentals=int(transcendentals),
                           bytes_accessed=int(bytes_accessed))

    out = pl.pallas_call(
        functools.partial(actor_kernel, max_action=float(max_action)),
        out_shape=jax.ShapeDtypeStruct((B_pad, A_pad), jnp.float32),
        grid_spec=pltpu.PrefetchScalarGridSpec(
            num_scalar_prefetch=0,
            grid=grid,
            in_specs=[
                pl.BlockSpec((tile, state_dim), lambda i: (i, 0)),  # state tile (unpadded K)
                _resident_spec((state_dim, hidden)),                # W1
                _resident_spec((1, hidden)),                        # b1
                _resident_spec((hidden, hidden)),                   # W2
                _resident_spec((1, hidden)),                        # b2
                _resident_spec((hidden, A_pad)),                    # W3 (lane-padded)
                _resident_spec((1, A_pad)),                         # b3 (lane-padded)
            ],
            out_specs=pl.BlockSpec((tile, A_pad), lambda i: (i, 0)),
        ),
        compiler_params=pltpu.CompilerParams(
            dimension_semantics=("parallel",)),
        cost_estimate=cost,
    )(state, w1, b1, w2, b2, w3, b3)

    return out  # padded; valid region is out[:B, :action_dim]


def init_actor_params(key, state_dim, action_dim, hidden=256):
    """Deterministic init mimicking PyTorch Linear default (U(-1/sqrt(in), 1/sqrt(in))).
    Weights are stored already transposed to [in, out]."""
    ks = jax.random.split(key, 6)

    def uniform(k, shape, fan_in):
        bound = 1.0 / jnp.sqrt(jnp.float32(fan_in))
        return jax.random.uniform(k, shape, jnp.float32, -bound, bound)

    return {
        "w1": uniform(ks[0], (state_dim, hidden), state_dim),
        "b1": uniform(ks[1], (1, hidden), state_dim),
        "w2": uniform(ks[2], (hidden, hidden), hidden),
        "b2": uniform(ks[3], (1, hidden), hidden),
        "w3": uniform(ks[4], (hidden, action_dim), hidden),
        "b3": uniform(ks[5], (1, action_dim), hidden),
    }


if __name__ == "__main__":
    # Small, MuJoCo-like shapes: state_dim=17, action_dim=6, max_action=1.0.
    key = jax.random.PRNGKey(0)
    k_params, k_state = jax.random.split(key)

    state_dim, action_dim, max_action = 17, 6, 1.0
    hidden = 256

    raw = init_actor_params(k_params, state_dim, action_dim, hidden=hidden)

    # Pure-JAX reference (f32 weights).
    def ref(x, p):
        h1 = jnp.maximum(x @ p["w1"] + p["b1"], 0.0)
        h2 = jnp.maximum(h1 @ p["w2"] + p["b2"], 0.0)
        return max_action * jnp.tanh(h2 @ p["w3"] + p["b3"])

    # --- Test 1: tiny batch, f32 weights, tight tolerance. ---
    params_f32 = prepare_actor_params(raw)          # one-time prep (pad/cast hoisted)
    batch = 2
    state = jax.random.normal(k_state, (batch, state_dim), jnp.float32)
    out = jax.block_until_ready(actor_forward(state, params_f32, max_action))
    act = out[:batch, :action_dim]
    expected = ref(state, raw)
    assert act.shape == (batch, action_dim)
    assert jnp.allclose(act, expected, atol=1e-5, rtol=1e-5)

    # --- Test 2: multi-row batch with bf16 weights (relaxed tolerance). ---
    params_bf16 = prepare_actor_params(raw, weight_dtype=jnp.bfloat16)
    batch_big = 300
    state_big = jax.random.normal(jax.random.PRNGKey(1), (batch_big, state_dim),
                                  jnp.float32)
    out_big = jax.block_until_ready(
        actor_forward(state_big, params_bf16, max_action))
    act_big = out_big[:batch_big, :action_dim]
    expected_big = ref(state_big, raw)
    assert act_big.shape == (batch_big, action_dim)
    assert jnp.allclose(act_big, expected_big, atol=2e-2, rtol=2e-2)

    print("KERNEL_OK")
</pallas_src>

<mosaic_0001>
module attributes {stable_mosaic.version = 11 : i64} {
  func.func @actor_kernel(%arg0: i32, %arg1: memref<8x17xf32, #tpu.memory_space<vmem>>, %arg2: memref<17x256xf32, #tpu.memory_space<vmem>>, %arg3: memref<1x256xf32, #tpu.memory_space<vmem>>, %arg4: memref<256x256xf32, #tpu.memory_space<vmem>>, %arg5: memref<1x256xf32, #tpu.memory_space<vmem>>, %arg6: memref<256x128xf32, #tpu.memory_space<vmem>>, %arg7: memref<1x128xf32, #tpu.memory_space<vmem>>, %arg8: memref<8x128xf32, #tpu.memory_space<vmem>>) attributes {dimension_semantics = [#tpu.dimension_semantics<parallel>], iteration_bounds = array<i64: 1>, scalar_prefetch = 0 : i64, scratch_operands = 0 : i64, tpu.core_type = #tpu.core_type<tc>, window_params = [{transform_indices = @transform_0, window_bounds = array<i64: 8, 17>}, {pipeline_mode = #tpu.pipeline_mode<synchronous>, transform_indices = @transform_1, window_bounds = array<i64: 17, 256>}, {pipeline_mode = #tpu.pipeline_mode<synchronous>, transform_indices = @transform_2, window_bounds = array<i64: 1, 256>}, {pipeline_mode = #tpu.pipeline_mode<synchronous>, transform_indices = @transform_3, window_bounds = array<i64: 256, 256>}, {pipeline_mode = #tpu.pipeline_mode<synchronous>, transform_indices = @transform_4, window_bounds = array<i64: 1, 256>}, {pipeline_mode = #tpu.pipeline_mode<synchronous>, transform_indices = @transform_5, window_bounds = array<i64: 256, 128>}, {pipeline_mode = #tpu.pipeline_mode<synchronous>, transform_indices = @transform_6, window_bounds = array<i64: 1, 128>}, {transform_indices = @transform_7, window_bounds = array<i64: 8, 128>}]} {
    %c0 = arith.constant 0 : index
    %c0_0 = arith.constant 0 : index
    %0 = vector.load %arg1[%c0, %c0_0] : memref<8x17xf32, #tpu.memory_space<vmem>>, vector<8x17xf32>
    %c0_1 = arith.constant 0 : index
    %c0_2 = arith.constant 0 : index
    %1 = vector.load %arg2[%c0_1, %c0_2] : memref<17x256xf32, #tpu.memory_space<vmem>>, vector<17x256xf32>
    %cst = arith.constant dense<0.000000e+00> : vector<8x256xf32>
    %2 = tpu.matmul %0, %1, %cst {dimension_numbers = #tpu.dot_dimension_numbers<[1], [0], [0], [1], [0, 0, 1, 1], [], []>} : vector<8x17xf32>, vector<17x256xf32>, vector<8x256xf32> -> vector<8x256xf32>
    %c0_3 = arith.constant 0 : index
    %c0_4 = arith.constant 0 : index
    %3 = vector.load %arg3[%c0_3, %c0_4] : memref<1x256xf32, #tpu.memory_space<vmem>>, vector<1x256xf32>
    %4 = vector.broadcast %3 : vector<1x256xf32> to vector<8x256xf32>
    %5 = arith.addf %2, %4 : vector<8x256xf32>
    %cst_5 = arith.constant 0.000000e+00 : f32
    %6 = vector.broadcast %cst_5 : f32 to vector<8x256xf32>
    %7 = arith.maximumf %5, %6 : vector<8x256xf32>
    %c0_6 = arith.constant 0 : index
    %c0_7 = arith.constant 0 : index
    %8 = vector.load %arg4[%c0_6, %c0_7] : memref<256x256xf32, #tpu.memory_space<vmem>>, vector<256x256xf32>
    %cst_8 = arith.constant dense<0.000000e+00> : vector<8x256xf32>
    %9 = tpu.matmul %7, %8, %cst_8 {dimension_numbers = #tpu.dot_dimension_numbers<[1], [0], [0], [1], [0, 0, 1, 1], [], []>} : vector<8x256xf32>, vector<256x256xf32>, vector<8x256xf32> -> vector<8x256xf32>
    %c0_9 = arith.constant 0 : index
    %c0_10 = arith.constant 0 : index
    %10 = vector.load %arg5[%c0_9, %c0_10] : memref<1x256xf32, #tpu.memory_space<vmem>>, vector<1x256xf32>
    %11 = vector.broadcast %10 : vector<1x256xf32> to vector<8x256xf32>
    %12 = arith.addf %9, %11 : vector<8x256xf32>
    %cst_11 = arith.constant 0.000000e+00 : f32
    %13 = vector.broadcast %cst_11 : f32 to vector<8x256xf32>
    %14 = arith.maximumf %12, %13 : vector<8x256xf32>
    %c0_12 = arith.constant 0 : index
    %c0_13 = arith.constant 0 : index
    %15 = vector.load %arg6[%c0_12, %c0_13] : memref<256x128xf32, #tpu.memory_space<vmem>>, vector<256x128xf32>
    %cst_14 = arith.constant dense<0.000000e+00> : vector<8x128xf32>
    %16 = tpu.matmul %14, %15, %cst_14 {dimension_numbers = #tpu.dot_dimension_numbers<[1], [0], [0], [1], [0, 0, 1, 1], [], []>} : vector<8x256xf32>, vector<256x128xf32>, vector<8x128xf32> -> vector<8x128xf32>
    %c0_15 = arith.constant 0 : index
    %c0_16 = arith.constant 0 : index
    %17 = vector.load %arg7[%c0_15, %c0_16] : memref<1x128xf32, #tpu.memory_space<vmem>>, vector<1x128xf32>
    %18 = vector.broadcast %17 : vector<1x128xf32> to vector<8x128xf32>
    %19 = arith.addf %16, %18 : vector<8x128xf32>
    %20 = math.tanh %19 : vector<8x128xf32>
    %cst_17 = arith.constant 1.000000e+00 : f32
    %21 = vector.broadcast %cst_17 : f32 to vector<8x128xf32>
    %22 = arith.mulf %21, %20 : vector<8x128xf32>
    %c0_18 = arith.constant 0 : index
    %c0_19 = arith.constant 0 : index
    %23 = vector.load %arg8[%c0_18, %c0_19] : memref<8x128xf32, #tpu.memory_space<vmem>>, vector<8x128xf32>
    tpu.vector_store %arg8[%c0_18, %c0_19], %22 {strides = array<i32>} : memref<8x128xf32, #tpu.memory_space<vmem>>, vector<8x128xf32>,
    return
  }
  func.func @transform_0(%arg0: i32) -> (i32, i32) {
    %c0_i32 = arith.constant 0 : i32
    %c0_i32_0 = arith.constant 0 : i32
    return %arg0, %c0_i32 : i32, i32
  }
  func.func @transform_1(%arg0: i32) -> (i32, i32) {
    %c0_i32 = arith.constant 0 : i32
    %c0_i32_0 = arith.constant 0 : i32
    %c0_i32_1 = arith.constant 0 : i32
    return %c0_i32, %c0_i32_0 : i32, i32
  }
  func.func @transform_2(%arg0: i32) -> (i32, i32) {
    %c0_i32 = arith.constant 0 : i32
    %c0_i32_0 = arith.constant 0 : i32
    %c0_i32_1 = arith.constant 0 : i32
    return %c0_i32, %c0_i32_0 : i32, i32
  }
  func.func @transform_3(%arg0: i32) -> (i32, i32) {
    %c0_i32 = arith.constant 0 : i32
    %c0_i32_0 = arith.constant 0 : i32
    %c0_i32_1 = arith.constant 0 : i32
    return %c0_i32, %c0_i32_0 : i32, i32
  }
  func.func @transform_4(%arg0: i32) -> (i32, i32) {
    %c0_i32 = arith.constant 0 : i32
    %c0_i32_0 = arith.constant 0 : i32
    %c0_i32_1 = arith.constant 0 : i32
    return %c0_i32, %c0_i32_0 : i32, i32
  }
  func.func @transform_5(%arg0: i32) -> (i32, i32) {
    %c0_i32 = arith.constant 0 : i32
    %c0_i32_0 = arith.constant 0 : i32
    %c0_i32_1 = arith.constant 0 : i32
    return %c0_i32, %c0_i32_0 : i32, i32
  }
  func.func @transform_6(%arg0: i32) -> (i32, i32) {
    %c0_i32 = arith.constant 0 : i32
    %c0_i32_0 = arith.constant 0 : i32
    %c0_i32_1 = arith.constant 0 : i32
    return %c0_i32, %c0_i32_0 : i32, i32
  }
  func.func @transform_7(%arg0: i32) -> (i32, i32) {
    %c0_i32 = arith.constant 0 : i32
    %c0_i32_0 = arith.constant 0 : i32
    return %arg0, %c0_i32 : i32, i32
  }
}

</mosaic_0001>

<bundles_post_ra>
// kernel: tpu_custom_call.1
= control target key start
LH: loop header
LB: loop body
LE: loop exit
PB: predicated region body
PF: predicated region fallthrough
CT: control target
= control target key end

     0   :  { %12 = vsyncpa [#allocation3], 0  ;;  %s693_s0 = inlined_call_operand.hbm [shape: f32[8,17], index: 0, kind: input, shape index: {}]   ;;  %s694_s1 = inlined_call_operand.hbm [shape: f32[17,256], index: 1, kind: input, shape index: {}]   ;;  %s695_s2 = inlined_call_operand.vmem [shape: f32[1,256], index: 2, kind: input, shape index: {}]   ;;  %s696_s3 = inlined_call_operand.hbm [shape: f32[256,256], index: 3, kind: input, shape index: {}]   ;;  %s697_s4 = inlined_call_operand.vmem [shape: f32[1,256], index: 4, kind: input, shape index: {}]   ;;  %s698_s5 = inlined_call_operand.hbm [shape: f32[256,128], index: 5, kind: input, shape index: {}]   ;;  %s699_s6 = inlined_call_operand.vmem [shape: f32[1,128], index: 6, kind: input, shape index: {}]   ;;  %s700_s7 = inlined_call_operand.hbm [shape: f32[8,128], index: 7, kind: output, shape index: {}]  }
   0x1   :  { %13 = vsyncpa [#allocation6], 0 }
   0x2   :  { %14 = vsyncpa [#allocation9], 0 }
   0x3   :  { %15 = vsyncpa [#allocation4], 0  ;;  %s619_s24 = smov [#allocation5]  }
   0x4   :  { %s31_s25 = sshll.u32 %s619_s24, 4  ;;  %s32_s25 = int_to_ptr.vmem [resolvable:$true] %s31_s25 }
   0x5   :  { %s519_s26 = scalar_lea.vmem %s32_s25, 768  ;;  %p524_p1 = scmp.lt.s32.totalorder %s32_s25, %s32_s25 }
   0x6   :  { %p520_p0 = scmp.ne.s32.totalorder %s32_s25, %s519_s26  ;;  %p525_p2 = scmp.lt.s32.totalorder %s519_s26, %s519_s26 }
   0x8   :  { %p526_p3 = por %p525_p2, %p524_p1 }
   0xa   :  { %p527_p4 = pnand %p526_p3, %p520_p0 }
   0xc   :  { %530 = shalt.err (!%p527_p4)
}
   0xd   :  { %s620_s27 = smov 256   ;;  %s621_s28 = smov 16  }
   0xe   :  { %37 = dma.hbm_to_vmem [thread:$0]  %s694_s1, 768, %s32_s25, [#allocation6], %s620_s27, %s620_s27, %s621_s28  }
   0xf   :  { %s622_s8 = smov [#allocation2]   ;;  %s623_s10 = smov [#allocation7]  }
  0x10   :  { %s22_s9 = sshll.u32 %s622_s8, 4  ;;  %s45_s11 = sshll.u32 %s623_s10, 4  ;;  %s23_s9 = int_to_ptr.vmem [resolvable:$true] %s22_s9  ;;  %s46_s11 = int_to_ptr.vmem [resolvable:$true] %s45_s11 }
  0x11   :  { %s539_s12 = scalar_lea.vmem %s23_s9, 128  ;;  %p544_p6 = scmp.lt.s32.totalorder %s23_s9, %s23_s9 }
  0x12   :  { %p540_p5 = scmp.ne.s32.totalorder %s23_s9, %s539_s12  ;;  %p545_p7 = scmp.lt.s32.totalorder %s539_s12, %s539_s12 }
  0x14   :  { %p546_p8 = por %p545_p7, %p544_p6 }
  0x16   :  { %p547_p9 = pnand %p546_p8, %p540_p5 }
  0x18   :  { %550 = shalt.err (!%p547_p9)
}
  0x19   :  { %25 = dma.hbm_to_vmem [thread:$0]  %s693_s0, 128, %s23_s9, [#allocation3]  }
  0x1a   :  { %s559_s15 = scalar_lea.vmem %s46_s11, 8192  ;;  %p564_p11 = scmp.lt.s32.totalorder %s46_s11, %s46_s11 }
  0x1b   :  { %p560_p10 = scmp.ne.s32.totalorder %s46_s11, %s559_s15  ;;  %p565_p12 = scmp.lt.s32.totalorder %s559_s15, %s559_s15 }
  0x1d   :  { %p566_p13 = por %p565_p12, %p564_p11 }
  0x1f   :  { %p567_p0 = pnand %p566_p13, %p560_p10 }
  0x21   :  { %570 = shalt.err (!%p567_p0)
}
  0x22   :  { %51 = dma.hbm_to_vmem [thread:$0]  %s696_s3, 8192, %s46_s11, [#allocation6], %s620_s27, %s620_s27, %s621_s28  }
  0x23   :  { %s624_s17 = smov [#allocation8]  }
  0x24   :  { %s59_s18 = sshll.u32 %s624_s17, 4  ;;  %s60_s18 = int_to_ptr.vmem [resolvable:$true] %s59_s18 }
  0x25   :  { %s579_s19 = scalar_lea.vmem %s60_s18, 4096  ;;  %p584_p2 = scmp.lt.s32.totalorder %s60_s18, %s60_s18 }
  0x26   :  { %p580_p1 = scmp.ne.s32.totalorder %s60_s18, %s579_s19  ;;  %p585_p3 = scmp.lt.s32.totalorder %s579_s19, %s579_s19 }
  0x28   :  { %p586_p4 = por %p585_p3, %p584_p2 }
  0x2a   :  { %p587_p5 = pnand %p586_p4, %p580_p1 }
  0x2c   :  { %590 = shalt.err (!%p587_p5)
}
  0x2d   :  { %s625_s0 = smov 128   ;;  %s626_s20 = smov 8  }
  0x2e   :  { %65 = dma.hbm_to_vmem [thread:$0]  %s698_s5, 4096, %s60_s18, [#allocation9], %s625_s0, %s625_s0, %s626_s20  }
  0x2f   :  { %611 = dma.done.wait [#allocation3], 128  }
  0x30   :  { %612 = vsyncadd [#allocation3], 4294967168 }
  0x31   :  { %613 = dma.done.wait [#allocation6], 8960  }
  0x32   :  { %614 = vsyncadd [#allocation6], 4294958336 }
  0x33   :  { %615 = dma.done.wait [#allocation9], 4096  }
  0x34   :  { %616 = vsyncadd [#allocation9], 4294963200  ;;  %v627_v0 = vmov 0.0   ;;  %vm103_vm0 = vcmask 1040384   ;;  %v86_v1 = vld [vmem:[#allocation5 + $0x28] sm:$0x1] }
  0x35   :  { %174 = vmatprep.mubr.f32.mxu0 %v627_v0  ;;  %v85_v2 = vld [vmem:[#allocation5 + $0x20] sm:$0x1]  ;;  %v84_v3 = vld [vmem:[#allocation5 + $0x18] sm:$0xff]  ;;  %460 = vmatprep.subr.msk.mxu0 %vm103_vm0, %v86_v1  ;;  %v83_v4 = vld [vmem:[#allocation5 + $0x10] sm:$0xff]  ;;  %vm99_vm1 = vcmask 138240  }
  0x36   :  { %461 = vmatpush1.msk.msra.mxu0 %vm103_vm0, %v85_v2  ;;  %v82_v5 = vld [vmem:[#allocation5 + $0x8] sm:$0xff]  ;;  %v213_v7 = vld [vmem:[#allocation7 + $0xf0] sm:$0xff]  ;;  %v212_v9 = vld [vmem:[#allocation7 + $0xe8] sm:$0xff] }
  0x37   :  { %v214_v6 = vld [vmem:[#allocation7 + $0xf8] sm:$0xff]  ;;  %138 = vmatprep.subr.mxu0 %v84_v3  ;;  %v81_v8 = vld [vmem:[#allocation5] sm:$0xff]  ;;  %v211_v10 = vld [vmem:[#allocation7 + $0xe0] sm:$0xff] }
  0x38   :  { %259 = vmatprep.subr.mxu1 %v214_v6  ;;  %139 = vmatpush1.msra.mxu0 %v83_v4  ;;  %v80_v11 = vld [vmem:[#allocation2] sm:$0xff]  ;;  %v210_v12 = vld [vmem:[#allocation7 + $0xd8] sm:$0xff]  ;;  %v209_v13 = vld [vmem:[#allocation7 + $0xd0] sm:$0xff] }
  0x39   :  { %260 = vmatpush1.msra.mxu1 %v213_v7  ;;  %140 = vmatprep.subr.mxu0 %v82_v5  ;;  %v208_v14 = vld [vmem:[#allocation7 + $0xc8] sm:$0xff]  ;;  %v207_v15 = vld [vmem:[#allocation7 + $0xc0] sm:$0xff]  ;;  %v206_v16 = vld [vmem:[#allocation7 + $0xb8] sm:$0xff] }
  0x3a   :  { %261 = vmatprep.subr.mxu1 %v212_v9  ;;  %141 = vmatpush1.msra.mxu0 %v81_v8  ;;  %v205_v17 = vld [vmem:[#allocation7 + $0xb0] sm:$0xff]  ;;  %v204_v18 = vld [vmem:[#allocation7 + $0xa8] sm:$0xff]  ;;  %v203_v19 = vld [vmem:[#allocation7 + $0xa0] sm:$0xff] }
  0x3b   :  { %262 = vmatpush1.msra.mxu1 %v211_v10  ;;  %462 = vmatmul.mubr.msk.f32.vlgmr.msra.gmra.mxu0 %vm99_vm1, %v80_v11  ;;  %v202_v20 = vld [vmem:[#allocation7 + $0x98] sm:$0xff]  ;;  %v201_v21 = vld [vmem:[#allocation7 + $0x90] sm:$0xff]  ;;  %v200_v22 = vld [vmem:[#allocation7 + $0x88] sm:$0xff] }
  0x3c   :  { %263 = vmatprep.subr.mxu1 %v210_v12  ;;  %v199_v23 = vld [vmem:[#allocation7 + $0x80] sm:$0xff]  ;;  %v198_v24 = vld [vmem:[#allocation7 + $0x78] sm:$0xff]  ;;  %v197_v25 = vld [vmem:[#allocation7 + $0x70] sm:$0xff] }
  0x3d   :  { %264 = vmatpush1.msra.mxu1 %v209_v13  ;;  %v196_v26 = vld [vmem:[#allocation7 + $0x68] sm:$0xff]  ;;  %v195_v27 = vld [vmem:[#allocation7 + $0x60] sm:$0xff]  ;;  %v194_v28 = vld [vmem:[#allocation7 + $0x58] sm:$0xff] }
  0x3e   :  { %265 = vmatprep.subr.mxu1 %v208_v14  ;;  %v193_v29 = vld [vmem:[#allocation7 + $0x50] sm:$0xff]  ;;  %v192_v30 = vld [vmem:[#allocation7 + $0x48] sm:$0xff]  ;;  %v191_v31 = vld [vmem:[#allocation7 + $0x40] sm:$0xff] }
  0x3f   :  { %266 = vmatpush1.msra.mxu1 %v207_v15  ;;  %v190_v32 = vld [vmem:[#allocation7 + $0x38] sm:$0xff]  ;;  %v189_v33 = vld [vmem:[#allocation7 + $0x30] sm:$0xff]  ;;  %v188_v34 = vld [vmem:[#allocation7 + $0x28] sm:$0xff] }
  0x40   :  { %267 = vmatprep.subr.mxu1 %v206_v16  ;;  %v187_v35 = vld [vmem:[#allocation7 + $0x20] sm:$0xff]  ;;  %v186_v36 = vld [vmem:[#allocation7 + $0x18] sm:$0xff]  ;;  %v185_v37 = vld [vmem:[#allocation7 + $0x10] sm:$0xff] }
  0x41   :  { %268 = vmatpush1.msra.mxu1 %v205_v17  ;;  %v184_v38 = vld [vmem:[#allocation7 + $0x8] sm:$0xff]  ;;  %v183_v39 = vld [vmem:[#allocation7] sm:$0xff]  ;;  %v246_v40 = vld [vmem:[#allocation7 + $0x1f8] sm:$0xff] }
  0x42   :  { %269 = vmatprep.subr.mxu1 %v204_v18  ;;  %v245_v41 = vld [vmem:[#allocation7 + $0x1f0] sm:$0xff]  ;;  %v244_v42 = vld [vmem:[#allocation7 + $0x1e8] sm:$0xff]  ;;  %v243_v43 = vld [vmem:[#allocation7 + $0x1e0] sm:$0xff] }
  0x43   :  { %270 = vmatpush1.msra.mxu1 %v203_v19  ;;  %v242_v44 = vld [vmem:[#allocation7 + $0x1d8] sm:$0xff]  ;;  %v241_v45 = vld [vmem:[#allocation7 + $0x1d0] sm:$0xff]  ;;  %v240_v46 = vld [vmem:[#allocation7 + $0x1c8] sm:$0xff] }
  0x44   :  { %271 = vmatprep.subr.mxu1 %v202_v20  ;;  %v239_v47 = vld [vmem:[#allocation7 + $0x1c0] sm:$0xff]  ;;  %v238_v48 = vld [vmem:[#allocation7 + $0x1b8] sm:$0xff]  ;;  %v237_v49 = vld [vmem:[#allocation7 + $0x1b0] sm:$0xff] }
  0x45   :  { %272 = vmatpush1.msra.mxu1 %v201_v21  ;;  %v236_v50 = vld [vmem:[#allocation7 + $0x1a8] sm:$0xff]  ;;  %v235_v51 = vld [vmem:[#allocation7 + $0x1a0] sm:$0xff]  ;;  %v234_v52 = vld [vmem:[#allocation7 + $0x198] sm:$0xff] }
  0x46   :  { %273 = vmatprep.subr.mxu1 %v200_v22  ;;  %v233_v53 = vld [vmem:[#allocation7 + $0x190] sm:$0xff]  ;;  %v232_v54 = vld [vmem:[#allocation7 + $0x188] sm:$0xff]  ;;  %v231_v55 = vld [vmem:[#allocation7 + $0x180] sm:$0xff] }
  0x47   :  { %274 = vmatpush1.msra.mxu1 %v199_v23  ;;  %v230_v56 = vld [vmem:[#allocation7 + $0x178] sm:$0xff]  ;;  %v229_v57 = vld [vmem:[#allocation7 + $0x170] sm:$0xff]  ;;  %v228_v58 = vld [vmem:[#allocation7 + $0x168] sm:$0xff] }
  0x48   :  { %275 = vmatprep.subr.mxu1 %v198_v24  ;;  %v227_v59 = vld [vmem:[#allocation7 + $0x160] sm:$0xff]  ;;  %v226_v60 = vld [vmem:[#allocation7 + $0x158] sm:$0xff]  ;;  %v225_v61 = vld [vmem:[#allocation7 + $0x150] sm:$0xff] }
  0x49   :  { %276 = vmatpush1.msra.mxu1 %v197_v25  ;;  %v224_v62 = vld [vmem:[#allocation7 + $0x148] sm:$0xff]  ;;  %v223_v63 = vld [vmem:[#allocation7 + $0x140] sm:$0xff]  ;;  %v222_v0 = vld [vmem:[#allocation7 + $0x138] sm:$0xff] }
  0x4a   :  { %277 = vmatprep.subr.mxu1 %v196_v26  ;;  %v221_v1 = vld [vmem:[#allocation7 + $0x130] sm:$0xff]  ;;  %v220_v2 = vld [vmem:[#allocation7 + $0x128] sm:$0xff]  ;;  %v219_v3 = vld [vmem:[#allocation7 + $0x120] sm:$0xff] }
  0x4b   :  { %278 = vmatpush1.msra.mxu1 %v195_v27  ;;  %v218_v4 = vld [vmem:[#allocation7 + $0x118] sm:$0xff]  ;;  %v217_v5 = vld [vmem:[#allocation7 + $0x110] sm:$0xff]  ;;  %v216_v6 = vld [vmem:[#allocation7 + $0x108] sm:$0xff] }
  0x4c   :  { %279 = vmatprep.subr.mxu1 %v194_v28  ;;  %v215_v7 = vld [vmem:[#allocation7 + $0x100] sm:$0xff]  ;;  %v363_v8 = vld [vmem:[#allocation8 + $0xf8] sm:$0xff]  ;;  %v362_v10 = vld [vmem:[#allocation8 + $0xf0] sm:$0xff] }
  0x4d   :  { %280 = vmatpush1.msra.mxu1 %v193_v29  ;;  %v347_v9 = vld [vmem:[#allocation8 + $0x78] sm:$0xff]  ;;  %464 = vmatprep.subr.mxu0 %v363_v8  ;;  %v346_v11 = vld [vmem:[#allocation8 + $0x70] sm:$0xff]  ;;  %v361_v12 = vld [vmem:[#allocation8 + $0xe8] sm:$0xff] }
  0x4e   :  { %281 = vmatprep.subr.mxu1 %v192_v30  ;;  %465 = vmatpush3.msra.mxu0 %v347_v9  ;;  %v345_v13 = vld [vmem:[#allocation8 + $0x68] sm:$0xff]  ;;  %v360_v14 = vld [vmem:[#allocation8 + $0xe0] sm:$0xff]  ;;  %v359_v16 = vld [vmem:[#allocation8 + $0xd8] sm:$0xff] }
  0x4f   :  { %282 = vmatpush1.msra.mxu1 %v191_v31  ;;  %466 = vmatprep.subr.mxu0 %v362_v10  ;;  %v344_v15 = vld [vmem:[#allocation8 + $0x60] sm:$0xff]  ;;  %v343_v17 = vld [vmem:[#allocation8 + $0x58] sm:$0xff]  ;;  %v358_v18 = vld [vmem:[#allocation8 + $0xd0] sm:$0xff] }
  0x50   :  { %283 = vmatprep.subr.mxu1 %v190_v32  ;;  %467 = vmatpush3.msra.mxu0 %v346_v11  ;;  %v342_v19 = vld [vmem:[#allocation8 + $0x50] sm:$0xff]  ;;  %v357_v20 = vld [vmem:[#allocation8 + $0xc8] sm:$0xff]  ;;  %v356_v22 = vld [vmem:[#allocation8 + $0xc0] sm:$0xff]  ;;  %v89_v32 = vlaneseq }
  0x51   :  { %284 = vmatpush1.msra.mxu1 %v189_v33  ;;  %468 = vmatprep.subr.mxu0 %v361_v12  ;;  %v341_v21 = vld [vmem:[#allocation8 + $0x48] sm:$0xff]  ;;  %v340_v23 = vld [vmem:[#allocation8 + $0x40] sm:$0xff]  ;;  %v355_v24 = vld [vmem:[#allocation8 + $0xb8] sm:$0xff] }
  0x52   :  { %285 = vmatprep.subr.mxu1 %v188_v34  ;;  %469 = vmatpush3.msra.mxu0 %v345_v13  ;;  %v339_v25 = vld [vmem:[#allocation8 + $0x38] sm:$0xff]  ;;  %v354_v26 = vld [vmem:[#allocation8 + $0xb0] sm:$0xff]  ;;  %v353_v28 = vld [vmem:[#allocation8 + $0xa8] sm:$0xff]  ;;  %v90_v33 = vshrl.u32 %v89_v32, 7 }
  0x53   :  { %286 = vmatpush1.msra.mxu1 %v187_v35  ;;  %470 = vmatprep.subr.mxu0 %v360_v14  ;;  %v338_v27 = vld [vmem:[#allocation8 + $0x30] sm:$0xff]  ;;  %v337_v29 = vld [vmem:[#allocation8 + $0x28] sm:$0xff]  ;;  %v352_v30 = vld [vmem:[#allocation8 + $0xa0] sm:$0xff] }
  0x54   :  { %287 = vmatprep.subr.mxu1 %v186_v36  ;;  %471 = vmatpush3.msra.mxu0 %v344_v15  ;;  %v336_v31 = vld [vmem:[#allocation8 + $0x20] sm:$0xff]  ;;  %v91_v34 = vsub.s32 0, %v90_v33  ;;  %v87_v35 = vld [vmem:[%s695_s2] sm:$0x3]  ;;  %v95_v36 = vsub.s32 1, %v90_v33 }
  0x55   :  { %288 = vmatpush1.msra.mxu1 %v185_v37  ;;  %472 = vmatprep.subr.mxu0 %v359_v16 }
  0x56   :  { %289 = vmatprep.subr.mxu1 %v184_v38  ;;  %473 = vmatpush3.msra.mxu0 %v343_v17  ;;  %v92_v37 = vrot.slane %v87_v35, %v91_v34  ;;  %v96_v38 = vrot.slane %v87_v35, %v95_v36 }
  0x57   :  { %290 = vmatpush1.msra.mxu1 %v183_v39  ;;  %474 = vmatprep.subr.mxu0 %v358_v18 }
  0x58   :  { %291 = vmatprep.subr.mxu1 %v246_v40  ;;  %475 = vmatpush3.msra.mxu0 %v342_v19 }
  0x59   :  { %292 = vmatpush2.msra.mxu1 %v245_v41  ;;  %476 = vmatprep.subr.mxu0 %v357_v20 }
  0x5a   :  { %293 = vmatprep.subr.mxu1 %v244_v42  ;;  %477 = vmatpush3.msra.mxu0 %v341_v21 }
  0x5b   :  { %294 = vmatpush2.msra.mxu1 %v243_v43  ;;  %478 = vmatprep.subr.mxu0 %v356_v22 }
  0x5c   :  { %295 = vmatprep.subr.mxu1 %v242_v44  ;;  %479 = vmatpush3.msra.mxu0 %v340_v23 }
  0x5d   :  { %296 = vmatpush2.msra.mxu1 %v241_v45  ;;  %480 = vmatprep.subr.mxu0 %v355_v24  ;;  %v351_v45 = vld [vmem:[#allocation8 + $0x98] sm:$0xff] }
  0x5e   :  { %297 = vmatprep.subr.mxu1 %v240_v46  ;;  %481 = vmatpush3.msra.mxu0 %v339_v25  ;;  %v335_v46 = vld [vmem:[#allocation8 + $0x18] sm:$0xff] }
  0x5f   :  { %298 = vmatpush2.msra.mxu1 %v239_v47  ;;  %482 = vmatprep.subr.mxu0 %v354_v26  ;;  %v350_v47 = vld [vmem:[#allocation8 + $0x90] sm:$0xff] }
  0x60   :  { %299 = vmatprep.subr.mxu1 %v238_v48  ;;  %483 = vmatpush3.msra.mxu0 %v338_v27  ;;  %v334_v48 = vld [vmem:[#allocation8 + $0x10] sm:$0xff] }
  0x61   :  { %300 = vmatpush2.msra.mxu1 %v237_v49  ;;  %484 = vmatprep.subr.mxu0 %v353_v28  ;;  %v349_v49 = vld [vmem:[#allocation8 + $0x88] sm:$0xff] }
  0x62   :  { %301 = vmatprep.subr.mxu1 %v236_v50  ;;  %485 = vmatpush3.msra.mxu0 %v337_v29  ;;  %v333_v50 = vld [vmem:[#allocation8 + $0x8] sm:$0xff] }
  0x63   :  { %302 = vmatpush2.msra.mxu1 %v235_v51  ;;  %486 = vmatprep.subr.mxu0 %v352_v30  ;;  %v348_v51 = vld [vmem:[#allocation8 + $0x80] sm:$0xff] }
  0x64   :  { %303 = vmatprep.subr.mxu1 %v234_v52  ;;  %487 = vmatpush3.msra.mxu0 %v336_v31  ;;  %v332_v52 = vld [vmem:[#allocation8] sm:$0xff] }
  0x65   :  { %304 = vmatpush2.msra.mxu1 %v233_v53  ;;  %488 = vmatprep.subr.mxu0 %v351_v45  ;;  %v247_v53 = vld [vmem:[%s697_s4] sm:$0x3]  ;;  %s628_s4 = smov [#allocation10]  }
  0x66   :  { %305 = vmatprep.subr.mxu1 %v232_v54  ;;  %489 = vmatpush3.msra.mxu0 %v335_v46  ;;  %v252_v54 = vrot.slane %v247_v53, %v91_v34  ;;  %s449_s26 = sshll.u32 %s628_s4, 4  ;;  %s450_s26 = int_to_ptr.vmem [resolvable:$true] %s449_s26 }
  0x67   :  { %306 = vmatpush2.msra.mxu1 %v231_v55  ;;  %490 = vmatprep.subr.mxu0 %v350_v47  ;;  %v256_v55 = vrot.slane %v247_v53, %v95_v36  ;;  %s591_s27 = scalar_lea.vmem %s450_s26, 128  ;;  %p596_p7 = scmp.lt.s32.totalorder %s450_s26, %s450_s26 }
  0x68   :  { %307 = vmatprep.subr.mxu1 %v230_v56  ;;  %491 = vmatpush3.msra.mxu0 %v334_v48  ;;  %p592_p6 = scmp.ne.s32.totalorder %s450_s26, %s591_s27  ;;  %p597_p8 = scmp.lt.s32.totalorder %s591_s27, %s591_s27 }
  0x69   :  { %308 = vmatpush2.msra.mxu1 %v229_v57  ;;  %492 = vmatprep.subr.mxu0 %v349_v49 }
  0x6a   :  { %309 = vmatprep.subr.mxu1 %v228_v58  ;;  %493 = vmatpush3.msra.mxu0 %v333_v50  ;;  %p598_p9 = por %p597_p8, %p596_p7 }
  0x6b   :  { %310 = vmatpush2.msra.mxu1 %v227_v59  ;;  %494 = vmatprep.subr.mxu0 %v348_v51 }
  0x6c   :  { %311 = vmatprep.subr.mxu1 %v226_v60  ;;  %495 = vmatpush3.msra.mxu0 %v332_v52  ;;  %p599_p10 = pnand %p598_p9, %p592_p6 }
  0x6d   :  { %312 = vmatpush2.msra.mxu1 %v225_v61 }
  0x6e   :  { %313 = vmatprep.subr.mxu1 %v224_v62 }
  0x6f   :  { %314 = vmatpush2.msra.mxu1 %v223_v63  ;;  %v463_v63 = vld [vmem:[%s699_s6] ss:$0 sm:$0xff] }
  0x70   :  { %315 = vmatprep.subr.mxu1 %v222_v0 }
  0x71   :  { %316 = vmatpush2.msra.mxu1 %v221_v1 }
  0x72   :  { %317 = vmatprep.subr.mxu1 %v220_v2 }
  0x73   :  { %318 = vmatpush2.msra.mxu1 %v219_v3 }
  0x74   :  { %319 = vmatprep.subr.mxu1 %v218_v4 }
  0x75   :  { %320 = vmatpush2.msra.mxu1 %v217_v5 }
  0x76   :  { %321 = vmatprep.subr.mxu1 %v216_v6 }
  0x77   :  { %322 = vmatpush2.msra.mxu1 %v215_v7 }
  0xfb   :  { %v176_v39 = vpop.f32.mrf.mxu0 }
  0xfc   :  { %v177_v40 = vadd.f32 %v176_v39, %v92_v37 }
  0xfd   :  { %v178_v41 = vpop.f32.mrf.mxu0 }
  0xfe   :  { %v179_v42 = vadd.f32 %v178_v41, %v96_v38  ;;  %v181_v44 = vmax.f32 %v177_v40, 0.0 }
 0x100   :  { %v182_v43 = vmax.f32 %v179_v42, 0.0 }
 0x102   :  { %323 = vmatprep.mubr.f32.mxu1 %v182_v43 }
 0x103   :  { %324 = vmatmul.mubr.f32.vlgmr.msra.gmra.mxu1 %v181_v44 }
 0x1c3   :  { %v325_v56 = vpop.f32.mrf.mxu1 }
 0x1c4   :  { %v326_v57 = vadd.f32 %v325_v56, %v252_v54 }
 0x1c5   :  { %v327_v58 = vpop.f32.mrf.mxu1 }
 0x1c6   :  { %v328_v59 = vadd.f32 %v327_v58, %v256_v55  ;;  %v330_v61 = vmax.f32 %v326_v57, 0.0 }
 0x1c8   :  { %v331_v60 = vmax.f32 %v328_v59, 0.0 }
 0x1ca   :  { %435 = vmatprep.mubr.f32.mxu0 %v331_v60 }
 0x1cb   :  { %436 = vmatmul.mubr.f32.vlgmr.msra.gmra.mxu0 %v330_v61 }
 0x28b   :  { %v496_v62 = vpop.f32.mrf.mxu0 }
 0x28d   :  { %v497_v0 = vpop.f32.mrf.mxu0 }
 0x28e   :  { %v498_v1 = vadd.f32 %v497_v0, %v496_v62 }
 0x290   :  { %v438_v2 = vadd.f32 %v498_v1, %v463_v63 }
 0x292   :  { %509 = vtanh.f32 %v438_v2 }
 0x29f   :  { %v510_v3 = vpop.eup %509 }
 0x2a0   :  { %442 = vst [vmem:[#allocation10] sm:$0xff] %v510_v3 }
 0x2a1   :  { %602 = shalt.err (!%p599_p10)
}
 0x2a2   :  { %452 = dma.vmem_to_hbm [thread:$0]  %s450_s26, 128, %s700_s7, [#allocation4]  }
 0x2a3   :  { %617 = dma.done.wait [#allocation4], 128  }
 0x2a4   :  { %618 = vsyncadd [#allocation4], 4294967168 }
 0x2a5   :  { %456 = vsyncpa [#allocation3], 1 }
 0x2a6   :  { %457 = vsyncpa [#allocation6], 1 }
 0x2a7   :  { %458 = vsyncpa [#allocation9], 1 }
 0x2a8   :  { %459 = vsyncpa [#allocation4], 1 }

</bundles_post_ra>
